<compile_context>
chip_gen: v7x
topology: tpu7x:2x2x1
jax: 0.10.0
libtpu: 0.0.40
codegen_flags: <defaults>
</compile_context>

<pallas_src>
import math
from functools import partial

import jax
import jax.numpy as jnp
from jax.experimental import pallas as pl
from jax.experimental.pallas import tpu as pltpu


_TARGET_BLOCK_BYTES = 2 * 1024 * 1024   # ~2 MiB per x/out tile (double-buffered)


def make_pos_embedding(embedding_size, maxlen, dtype=jnp.float32):
    """Deterministic buffer init, exactly mirroring the torch __init__."""
    den = jnp.exp(
        -jnp.arange(0, embedding_size, 2, dtype=jnp.float32)
        * math.log(10000.0)
        / embedding_size
    )
    pos = jnp.arange(0, maxlen, dtype=jnp.float32).reshape(maxlen, 1)
    pe = jnp.zeros((maxlen, embedding_size), dtype=jnp.float32)
    pe = pe.at[:, 0::2].set(jnp.sin(pos * den))
    pe = pe.at[:, 1::2].set(jnp.cos(pos * den))
    # torch: pos_embedding.unsqueeze(-2).transpose(0, 1) -> (1, maxlen, E)
    pe = pe[:, None, :].transpose(1, 0, 2)
    return pe.astype(dtype)


def _row_kernel(x_ref, pe_ref, o_ref, *, rows_per_block, n_pe_blocks):
    """x_ref/o_ref: (TR, L) row tile.  pe_ref: full (P, L) table resident in VMEM."""
    if n_pe_blocks == 1:
        pe_tile = pe_ref[...]
    else:
        i = pl.program_id(0)
        off = pl.multiple_of((i % n_pe_blocks) * rows_per_block, rows_per_block)
        pe_tile = pe_ref[pl.ds(off, rows_per_block), :]
    o_ref[...] = (x_ref[...].astype(pe_tile.dtype) + pe_tile).astype(o_ref.dtype)


def _slab_kernel(x_ref, pe_ref, o_ref):
    """Fallback for tiny / odd shapes: one (1, S, E) slab per batch element."""
    o_ref[...] = (x_ref[...].astype(pe_ref.dtype) + pe_ref[...]).astype(o_ref.dtype)


def _largest_divisor_mult8(n, cap):
    """Largest divisor of n that is a multiple of 8 and <= cap (0 if none)."""
    best = 0
    d = 8
    lim = min(n, cap)
    while d <= lim:
        if n % d == 0:
            best = d
        d += 8
    return best


def positional_encoding(token_embedding, pos_embedding):
    """token_embedding: (B, S, E); pos_embedding: (1, maxlen, E) with S == maxlen."""
    B, S, E = token_embedding.shape
    assert pos_embedding.ndim == 3 and pos_embedding.shape[0] == 1
    maxlen = pos_embedding.shape[1]
    assert pos_embedding.shape[2] == E
    # Faithful to torch: pos_embedding[:B] stays (1, maxlen, E) and the add
    # broadcasts over batch, which requires S == maxlen.
    assert S == maxlen, f"sequence length {S} must equal maxlen {maxlen}"

    # Match torch type promotion (fp32 buffer + bf16 input -> fp32 result).
    compute_dtype = jnp.promote_types(token_embedding.dtype, pos_embedding.dtype)
    x_itemsize = jnp.dtype(token_embedding.dtype).itemsize
    c_itemsize = jnp.dtype(compute_dtype).itemsize
    elem_bytes = max(x_itemsize, c_itemsize)

    # ---- choose a lane-dense row layout -------------------------------------
    if E % 128 == 0:
        P, L = S, E                       # rows = sequence positions
    elif (S * E) % 128 == 0:
        P, L = (S * E) // 128, 128        # fold S*E into 128-wide lane rows
    else:
        P, L = S, E                       # odd E: correct but not lane-dense

    cap = max(8, _TARGET_BLOCK_BYTES // (L * elem_bytes))
    TR = _largest_divisor_mult8(P, cap)

    if TR > 0:
        # Row-tiled path: grid over (B*P)//TR row tiles (parallel -> both v7x
        # TensorCores get work even at B=1). PE table resident in VMEM
        # (constant index_map -> DMA'd once) and sliced per tile with pl.ds.
        x_rows = token_embedding.reshape(B * P, L)
        pe_rows = pos_embedding[0].reshape(P, L).astype(compute_dtype)
        n_blocks = (B * P) // TR
        tile_bytes = TR * L * elem_bytes
        pe_bytes = P * L * c_itemsize
        vmem_limit = int(min(max(pe_bytes + 8 * tile_bytes + (2 << 20), 32 << 20),
                             48 << 20))
        out = pl.pallas_call(
            partial(_row_kernel, rows_per_block=TR, n_pe_blocks=P // TR),
            out_shape=jax.ShapeDtypeStruct((B * P, L), compute_dtype),
            grid=(n_blocks,),
            in_specs=[
                pl.BlockSpec((TR, L), lambda i: (i, 0)),
                pl.BlockSpec((P, L), lambda i: (0, 0)),   # resident PE table
            ],
            out_specs=pl.BlockSpec((TR, L), lambda i: (i, 0)),
            compiler_params=pltpu.CompilerParams(
                dimension_semantics=("parallel",),
                vmem_limit_bytes=vmem_limit,
            ),
        )(x_rows, pe_rows)
        return out.reshape(B, S, E)

    # ---- fallback: tiny / odd shapes (previously verified blocking) ---------
    pe_sliced = pos_embedding[:B].astype(compute_dtype)   # (1, maxlen, E)
    slab_bytes = S * E * elem_bytes
    vmem_limit = int(min(max(S * E * c_itemsize + 6 * slab_bytes + (2 << 20),
                             32 << 20), 48 << 20))
    return pl.pallas_call(
        _slab_kernel,
        out_shape=jax.ShapeDtypeStruct((B, S, E), compute_dtype),
        grid=(B,),
        in_specs=[
            pl.BlockSpec((1, S, E), lambda b: (b, 0, 0)),
            pl.BlockSpec((1, S, E), lambda b: (0, 0, 0)),
        ],
        out_specs=pl.BlockSpec((1, S, E), lambda b: (b, 0, 0)),
        compiler_params=pltpu.CompilerParams(
            dimension_semantics=("parallel",),
            vmem_limit_bytes=vmem_limit,
        ),
    )(token_embedding, pe_sliced)


if __name__ == "__main__":
    # Lane-dense small shapes: E multiple of 128 exercises the row-tiled path.
    embedding_size = 128
    maxlen = 8
    batch = 2

    key = jax.random.PRNGKey(0)
    x = jax.random.normal(key, (batch, maxlen, embedding_size), dtype=jnp.float32)
    pos_embedding = make_pos_embedding(embedding_size, maxlen)

    out = jax.block_until_ready(positional_encoding(x, pos_embedding))
    ref = x + pos_embedding[:batch]         # dropout(p=1e-7) == identity in eval
    assert out.shape == (batch, maxlen, embedding_size)
    assert jnp.allclose(out, ref, atol=1e-6), "row-tiled path mismatch"

    # Also exercise the small/odd-E fallback path (E=32, like the original demo).
    x2 = jax.random.normal(jax.random.PRNGKey(1), (2, 8, 32), dtype=jnp.float32)
    pe2 = make_pos_embedding(32, 8)
    out2 = jax.block_until_ready(positional_encoding(x2, pe2))
    assert out2.shape == (2, 8, 32)
    assert jnp.allclose(out2, x2 + pe2[:2], atol=1e-6), "fallback path mismatch"

    print("KERNEL_OK")
</pallas_src>

<mosaic_0001>
module attributes {stable_mosaic.version = 11 : i64} {
  func.func @_row_kernel(%arg0: i32, %arg1: memref<8x128xf32, #tpu.memory_space<vmem>>, %arg2: memref<8x128xf32, #tpu.memory_space<vmem>>, %arg3: memref<8x128xf32, #tpu.memory_space<vmem>>) attributes {dimension_semantics = [#tpu.dimension_semantics<parallel>], iteration_bounds = array<i64: 2>, scalar_prefetch = 0 : i64, scratch_operands = 0 : i64, tpu.core_type = #tpu.core_type<tc>, window_params = [{transform_indices = @transform_0, window_bounds = array<i64: 8, 128>}, {pipeline_mode = #tpu.pipeline_mode<synchronous>, transform_indices = @transform_1, window_bounds = array<i64: 8, 128>}, {transform_indices = @transform_2, window_bounds = array<i64: 8, 128>}]} {
    %c0 = arith.constant 0 : index
    %c0_0 = arith.constant 0 : index
    %0 = vector.load %arg2[%c0, %c0_0] : memref<8x128xf32, #tpu.memory_space<vmem>>, vector<8x128xf32>
    %c0_1 = arith.constant 0 : index
    %c0_2 = arith.constant 0 : index
    %1 = vector.load %arg1[%c0_1, %c0_2] : memref<8x128xf32, #tpu.memory_space<vmem>>, vector<8x128xf32>
    %2 = arith.addf %1, %0 : vector<8x128xf32>
    %c0_3 = arith.constant 0 : index
    %c0_4 = arith.constant 0 : index
    %3 = vector.load %arg3[%c0_3, %c0_4] : memref<8x128xf32, #tpu.memory_space<vmem>>, vector<8x128xf32>
    tpu.vector_store %arg3[%c0_3, %c0_4], %2 {strides = array<i32>} : memref<8x128xf32, #tpu.memory_space<vmem>>, vector<8x128xf32>,
    return
  }
  func.func @transform_0(%arg0: i32) -> (i32, i32) {
    %c0_i32 = arith.constant 0 : i32
    %c0_i32_0 = arith.constant 0 : i32
    return %arg0, %c0_i32 : i32, i32
  }
  func.func @transform_1(%arg0: i32) -> (i32, i32) {
    %c0_i32 = arith.constant 0 : i32
    %c0_i32_0 = arith.constant 0 : i32
    %c0_i32_1 = arith.constant 0 : i32
    return %c0_i32, %c0_i32_0 : i32, i32
  }
  func.func @transform_2(%arg0: i32) -> (i32, i32) {
    %c0_i32 = arith.constant 0 : i32
    %c0_i32_0 = arith.constant 0 : i32
    return %arg0, %c0_i32 : i32, i32
  }
}

</mosaic_0001>

<bundles_post_ra>
// kernel: tpu_custom_call.1
= control target key start
LH: loop header
LB: loop body
LE: loop exit
PB: predicated region body
PF: predicated region fallthrough
CT: control target
= control target key end

     0   :  { %7 = vsyncpa [#allocation3], 0  ;;  %s690_s0 = inlined_call_operand.hbm [shape: f32[16,128], index: 0, kind: input, shape index: {}]   ;;  %s691_s1 = inlined_call_operand.hbm [shape: f32[8,128], index: 1, kind: input, shape index: {}]   ;;  %s692_s2 = inlined_call_operand.hbm [shape: f32[16,128], index: 2, kind: output, shape index: {}]  }
   0x1   :  { %9 = vsyncpa [#allocation3 + $0x1], 0 }
   0x2   :  { %10 = vsyncpa [#allocation6], 0 }
   0x3   :  { %11 = vsyncpa [#allocation4], 0 }
   0x4   :  { %13 = vsyncpa [#allocation4 + $0x1], 0  ;;  %s489_s9 = smov 0   ;;  %s491_s10 = smov 0  }
   0x5   :  { %s493_s11 = smov 0   ;;  %s495_s12 = smov 0  }
   0x6 LB: > { %s510_s13 = sadd.s32 4294967295, %s469_s12   ;;  %s270_s14 = sadd.s32 4294967294, %s469_s12   ;;  %s469_s12 = sphi %s495_s12, %s716_s12   ;;  %s465_s11 = sphi %s493_s11, %s715_s11   ;;  %s461_s10 = sphi %s491_s10, %s714_s10   ;;  %s457_s9 = sphi %s489_s9, %s713_s9  }
   0x7   : > { %p39_p0 = scmp.ne.s32.totalorder %s461_s10, %s457_s9  ;;  %p693_p1 = scmp.eq.s32.totalorder %s510_s13, 0 }
   0x8   : > { %p90_p3 = scmp.eq.s32.totalorder %s270_s14, 1  ;;  %p271_p5 = scmp.ge.s32.totalorder %s469_s12, 1 }
   0x9   : > { %p519_p4 = por %p693_p1, %p39_p0  ;;  %p97_p7 = scmp.lt.s32.totalorder %s469_s12, 3 }
   0xa   : > { %p524_p6 = por %p90_p3, %p39_p0  ;;  %s471_s18 = smov [#allocation5]  }
   0xb   : > { %s696_s15 = scalar_select %p519_p4, 1, 0 }
   0xc   : > { %s697_s16 = scalar_select %p524_p6, 1, 0 }
   0xd   : > { %p529_p8 = pnand %p271_p5, %p97_p7  ;;  %s110_s19 = sshll.u32 %s471_s18, 4  ;;  %s111_s19 = int_to_ptr.vmem [resolvable:$true] %s110_s19 }
   0xe   : > { %s537_s20 = sadd.s32 1, %s469_s12   ;;  %s26_s24 = sadd.s32 1, %s465_s11 }
   0xf   : > { %s698_s17 = scalar_select %p529_p8, 1, 0 }
  0x10   : > { %p292_p10 = pneg %p529_p8  ;;  %s23_s22 = ssub.s32 %s469_s12, %s537_s20 }
  0x11   : > { %p547_p12 = scmp.eq.s32.totalorder %s23_s22, 0  ;;  %s341_s27 = scalar_lea.hbm %s691_s1, 128 }
  0x12   : > { %p541_p11 = pnand %p292_p10, %p693_p1  ;;  %p342_p0 = scmp.ne.s32.totalorder %s691_s1, %s341_s27 }
  0x13   : > { %s700_s23 = scalar_select %p547_p12, 1, 0 }
  0x14   : > { %p343_p3 = pneg %p541_p11  ;;  %p348_p10 = scmp.lt.u32.totalorder %s341_s27, %s691_s1 }
  0x16   : > { %p344_p5 = pnand %p343_p3, %p342_p0 }
  0x18   : > { %p345_p7 = pneg %p344_p5 }
  0x1a   : > { %p350_p9 = pnand %p348_p10, %p345_p7 }
  0x1c   : > { %353 = shalt.err (!%p350_p9)
}
  0x1d   : > { %s354_s4 = scalar_lea.vmem %s111_s19, 128  ;;  %p362_p6 = scmp.lt.s32.totalorder %s111_s19, %s111_s19 }
  0x1e   : > { %p355_p1 = scmp.ne.s32.totalorder %s111_s19, %s354_s4  ;;  %p363_p4 = scmp.lt.s32.totalorder %s354_s4, %s354_s4 }
  0x20   : > { %p357_p2 = pnand %p355_p1, %p343_p3  ;;  %p364_p8 = por %p363_p4, %p362_p6 }
  0x22   : > { %p358_p13 = pneg %p357_p2 }
  0x24   : > { %p365_p12 = pnand %p364_p8, %p358_p13 }
  0x26   : > { %368 = shalt.err (!%p365_p12)
}
  0x27   : > { %295 = dma.hbm_to_vmem [thread:$0]  (!%p541_p11), %s691_s1, 128, %s111_s19, [#allocation6]  }
  0x28   : > { %p701_p1 = scmp.ne.s32.totalorder %s700_s23, 0  ;;  %p34_p2 = scmp.eq.s32.totalorder %s469_s12, 0 }
  0x29   : > { %p702_p4 = scmp.ne.s32.totalorder %s465_s11, %s461_s10  ;;  %p703_p6 = scmp.eq.s32.totalorder %s510_s13, 1 }
  0x2a   : > { %s573_s7 = scalar_select %p701_p1, %s465_s11, %s26_s24  }
  0x2b   : > { %p581_p8 = por %p703_p6, %p702_p4  ;;  %p305_p9 = scmp.lt.s32.totalorder %s469_s12, 2 }
  0x2c   : > { %s121_s14 = sand.u32 1, %s465_s11   ;;  %p705_p12 = pmov %p702_p4 }
  0x2d   : > { %s274_s18 = sshll.u32 %s121_s14, 3  ;;  %s275_s21 = sshll.u32 %s469_s12, 7 }
  0x2e   : > { %p35_p13 = por %p34_p2, %p705_p12  ;;  %s594_s19 = scalar_lea.hbm %s690_s0, %s275_s21 }
  0x2f   : > { %s125_s23 = scalar_lea.vmem [#allocation2], %s274_s18  ;;  %s122_s27 = scalar_lea.sflag [#allocation3], %s121_s14 }
  0x30   : > { %s132_s24 = sshll.u32 %s125_s23, 4  ;;  %p596_p11 = pnand %p305_p9, %p35_p13  ;;  %s600_s24 = int_to_ptr.vmem [resolvable:$true] %s132_s24 }
  0x31   : > { %s369_s28 = scalar_lea.hbm %s594_s19, 128  ;;  %s374_s3 = scalar_lea.hbm %s690_s0, 256 }
  0x32   : > { %p370_p0 = scmp.ne.s32.totalorder %s594_s19, %s369_s28  ;;  %p371_p3 = pneg %p596_p11 }
  0x33   : > { %p375_p10 = scmp.lt.u32.totalorder %s594_s19, %s690_s0  ;;  %p376_p1 = scmp.lt.u32.totalorder %s374_s3, %s369_s28 }
  0x34   : > { %p372_p5 = pnand %p371_p3, %p370_p0  ;;  %p378_p4 = scmp.lt.u32.totalorder %s369_s28, %s594_s19 }
  0x35   : > { %p377_p2 = por %p376_p1, %p375_p10 }
  0x36   : > { %p373_p7 = pneg %p372_p5 }
  0x37   : > { %p379_p6 = por %p378_p4, %p377_p2 }
  0x39   : > { %p380_p9 = pnand %p379_p6, %p373_p7 }
  0x3b   : > { %383 = shalt.err (!%p380_p9)
}
  0x3c   : > { %s384_s6 = scalar_lea.vmem %s600_s24, 128  ;;  %s472_s14 = smov [#allocation2]  }
  0x3d   : > { %p385_p12 = scmp.ne.s32.totalorder %s600_s24, %s384_s6  ;;  %s389_s18 = sshll.u32 %s472_s14, 4  ;;  %s390_s18 = int_to_ptr.vmem [resolvable:$false] %s389_s18 }
  0x3e   : > { %s391_s21 = scalar_lea.vmem %s390_s18, 256  ;;  %p392_p5 = scmp.lt.s32.totalorder %s600_s24, %s390_s18 }
  0x3f   : > { %p387_p13 = pnand %p385_p12, %p371_p3  ;;  %p393_p10 = scmp.lt.s32.totalorder %s391_s21, %s384_s6 }
  0x41   : > { %p388_p0 = pneg %p387_p13  ;;  %p394_p1 = por %p393_p10, %p392_p5 }
  0x43   : > { %p395_p2 = pnand %p394_p1, %p388_p0 }
  0x45   : > { %398 = shalt.err (!%p395_p2)
}
  0x46   : > { %299 = dma.hbm_to_vmem [thread:$0]  (!%p596_p11), %s594_s19, 128, %s600_s24, %s122_s27  }
  0x47   : > { %p707_p7 = scmp.ne.s32.totalorder %s698_s17, 0 }
  0x48   : > { %s630_s22 = sand.u32 (!%p707_p7), 1, %s461_s10   ;;  %p708_p3 = scmp.ne.s32.totalorder (!%p707_p7), %s696_s15, 0 }
  0x49   : > { %141 = sbr.rel (%p707_p7) target bundleno = 109 (0x6d), region = 28  ;;  %s277_s25 = sshll.u32 (!%p707_p7), %s630_s22, 3 }
  0x4a   : > { %s144_s23 = scalar_lea.sflag (!%p707_p7), [#allocation3], %s630_s22  ;;  %s147_s28 = scalar_lea.vmem (!%p707_p7), [#allocation2], %s277_s25 }
  0x50   : > { %444 = dma.done.wait (%p708_p3), %s144_s23, 128  }
  0x51   : > { %446 = vsyncadd (%p708_p3), %s144_s23, 4294967168  ;;  %p709_p4 = scmp.eq.s32.totalorder %s510_s13, 0 }
  0x53   : > { %448 = dma.done.wait (%p709_p4), [#allocation6], 128   ;;  %p710_p11 = pmov %p709_p4 }
  0x54   : > { %s171_s17 = scalar_lea.vmem [#allocation7], %s277_s25  ;;  %s281_s24 = sshll.u32 %s510_s13, 7  ;;  %v172_v0 = vld [vmem:[#allocation5] sm:$0xff]  ;;  %v173_v1 = vld [vmem:[%s147_s28] sm:$0xff] }
  0x55   : > { %450 = vsyncadd (%p710_p11), [#allocation6], 4294967168  ;;  %s190_s19 = sshll.u32 %s171_s17, 4  ;;  %v174_v2 = vadd.f32 %v173_v1, %v172_v0  ;;  %s648_s27 = scalar_lea.hbm %s692_s2, %s281_s24  ;;  %s643_s19 = int_to_ptr.vmem [resolvable:$true] %s190_s19 }
  0x56   : > { %s177_s29 = scalar_lea.sflag [#allocation4], %s630_s22  ;;  %s399_s30 = scalar_lea.vmem %s643_s19, 128 }
  0x57   : > { %175 = vst [vmem:[%s171_s17] sm:$0xff] %v174_v2  ;;  %p400_p6 = scmp.ne.s32.totalorder %s643_s19, %s399_s30  ;;  %s473_s13 = smov [#allocation7]  }
  0x58   : > { %s403_s3 = sshll.u32 %s473_s13, 4  ;;  %s404_s3 = int_to_ptr.vmem [resolvable:$false] %s403_s3 }
  0x59   : > { %p401_p9 = pnand %p400_p6, %p581_p8  ;;  %s405_s4 = scalar_lea.vmem %s404_s3, 256 }
  0x5a   : > { %p406_p13 = scmp.lt.s32.totalorder %s643_s19, %s404_s3  ;;  %p407_p0 = scmp.lt.s32.totalorder %s405_s4, %s399_s30 }
  0x5b   : > { %p402_p12 = pneg %p401_p9 }
  0x5c   : > { %p408_p5 = por %p407_p0, %p406_p13 }
  0x5e   : > { %p409_p10 = pnand %p408_p5, %p402_p12 }
  0x60   : > { %412 = shalt.err (!%p409_p10)
}
  0x61   : > { %s413_s5 = scalar_lea.hbm %s648_s27, 128  ;;  %s417_s18 = scalar_lea.hbm %s692_s2, 256 }
  0x62   : > { %p414_p1 = scmp.ne.s32.totalorder %s648_s27, %s413_s5  ;;  %p418_p3 = scmp.lt.u32.totalorder %s648_s27, %s692_s2 }
  0x63   : > { %p419_p4 = scmp.lt.u32.totalorder %s417_s18, %s413_s5  ;;  %p421_p6 = scmp.lt.u32.totalorder %s413_s5, %s648_s27 }
  0x64   : > { %p415_p2 = pnand %p414_p1, %p581_p8 }
  0x65   : > { %p420_p11 = por %p419_p4, %p418_p3 }
  0x66   : > { %p416_p7 = pneg %p415_p2 }
  0x67   : > { %p422_p9 = por %p421_p6, %p420_p11 }
  0x69   : > { %p423_p12 = pnand %p422_p9, %p416_p7 }
  0x6b   : > { %426 = shalt.err (!%p423_p12)
}
  0x6c   : > { %290 = dma.vmem_to_hbm [thread:$0]  (%p581_p8), %s643_s19, 128, %s648_s27, %s177_s29  }
  0x6d PF: > { %s202_s25 = sand.u32 1, %s457_s9   ;;  %p711_p13 = scmp.ne.s32.totalorder %s697_s16, 0 }
  0x6e   : > { %p712_p0 = scmp.ge.s32.totalorder %s469_s12, 2  ;;  %s203_s23 = scalar_lea.sflag [#allocation4], %s202_s25 }
  0x70   : > { %p301_p5 = pnand %p712_p0, %p711_p13 }
  0x72   : > { %452 = dma.done.wait (!%p301_p5), %s203_s23, 128  }
  0x73   : > { %454 = vsyncadd (!%p301_p5), %s203_s23, 4294967168  ;;  %p16_p10 = scmp.ge.s32.totalorder %s537_s20, 4   ;;  %s713_s9 = smov %s461_s10 }
  0x74   : > { %s714_s10 = smov %s465_s11  ;;  %s715_s11 = smov %s573_s7 }
  0x75   : > { %s716_s12 = smov %s537_s20  ;;  %18 = sbr.rel (!%p16_p10) target bundleno = 6 (0x6), region = 77 }
  0x7c   :  { %208 = vsyncpa [#allocation3], 1 }
  0x7d   :  { %210 = vsyncpa [#allocation3 + $0x1], 1 }
  0x7e   :  { %211 = vsyncpa [#allocation6], 1 }
  0x7f   :  { %212 = vsyncpa [#allocation4], 1 }
  0x80   :  { %214 = vsyncpa [#allocation4 + $0x1], 1 }

</bundles_post_ra>
